<compile_context>
chip_gen: v7x
topology: tpu7x:2x2x1
jax: 0.10.0
libtpu: 0.0.40
codegen_flags: <defaults>
</compile_context>

<pallas_src>
import jax
import jax.numpy as jnp
from jax.experimental import pallas as pl
from jax.experimental.pallas import tpu as pltpu

# Small stand-in dims (real module uses 768 / 2048 / 512 / 2 for bert-base+resnet50).
BATCH = 8
TEXT_DIM = 128      # stand-in for text_feature_dim (bert hidden_size)
IMG_DIM = 256       # stand-in for img_feature_dim (resnet50 pooled dim)
HIDDEN = 512        # classifier hidden width (as in the module)
NUM_CLASSES = 2
OUT_PAD = 128       # lane-dense padded logits width


def _round_up(x, m):
    return (x + m - 1) // m * m


def _pick_tile_b(B):
    """Generation-aware batch tile.

    v5e : 128 rows fills the 4x128x128 MXU and keeps feature double-buffers small.
    v6e : 256 rows fills the 2x256x256 MXU once B is large enough.
    v7x : same, but clamp so the grid has >=2 steps (2 TensorCores).
    Tiny batches round to 16 rows (full bf16 sublane packing).
    """
    kind = ""
    try:
        kind = jax.devices()[0].device_kind.lower()
    except Exception:
        pass
    if B <= 128:
        return _round_up(max(B, 1), 16)
    big_mxu = ("v6" in kind) or ("v7" in kind)
    two_cores = "v7" in kind
    tile = 256 if (big_mxu and B >= 256) else 128
    if two_cores:
        b_pad = _round_up(B, 128)
        tile = min(tile, max(128, b_pad // 2))   # >=2 grid steps on v7x
    return tile


def fusion_head_kernel(txt_ref, img_ref, w1t_ref, w1i_ref, b1_ref,
                       w2_ref, b2_ref, out_ref):
    # In-kernel bf16 cast of f32 features (VPU, co-issues under the MXU slot).
    txt = txt_ref[...].astype(jnp.bfloat16)
    img = img_ref[...].astype(jnp.bfloat16)
    # concat fusion + first classifier Linear, split along the concat axis,
    # accumulated in f32 on the MXU.
    h = jnp.dot(txt, w1t_ref[...], preferred_element_type=jnp.float32)
    h = h + jnp.dot(img, w1i_ref[...], preferred_element_type=jnp.float32)
    h = h + b1_ref[...]                       # broadcast (1, HIDDEN) over batch
    h = jnp.maximum(h, 0.0)                   # ReLU (VPU)
    # dropout: identity at inference
    # second classifier Linear -> padded (tile_b, OUT_PAD) lane-dense logits slab
    logits = jnp.dot(h.astype(jnp.bfloat16), w2_ref[...],
                     preferred_element_type=jnp.float32)
    out_ref[...] = (logits + b2_ref[...]).astype(out_ref.dtype)


def prepare_params(raw_params, text_dim):
    """One-time (load-time) weight prep: bf16 cast + lane-dense padding.

    raw_params: (w1 [Dt+Di, H] f32, b1 [H] f32, w2 [H, nc] f32, b2 [nc] f32)
    Returns kernel-ready params; call ONCE, not per forward.
    """
    w1, b1, w2, b2 = raw_params
    nc = w2.shape[1]
    assert nc <= OUT_PAD, f"NUM_CLASSES={nc} exceeds OUT_PAD={OUT_PAD}"
    w1t = jnp.asarray(w1[:text_dim], jnp.bfloat16)
    w1i = jnp.asarray(w1[text_dim:], jnp.bfloat16)
    b1f = jnp.asarray(b1, jnp.float32).reshape(1, -1)
    w2p = jnp.pad(jnp.asarray(w2, jnp.float32),
                  ((0, 0), (0, OUT_PAD - nc))).astype(jnp.bfloat16)
    b2p = jnp.pad(jnp.asarray(b2, jnp.float32).reshape(1, -1),
                  ((0, 0), (0, OUT_PAD - nc)))
    return (w1t, w1i, b1f, w2p, b2p, nc)


def early_fusion_forward(text_features, img_features, kparams, tile_b=None):
    """Pallas equivalent of EarlyFusionModel's concat fusion + classifier head.

    text_features / img_features: f32 pooled backbone outputs (cast to bf16
    inside the kernel).  kparams: output of prepare_params().
    """
    w1t, w1i, b1, w2p, b2p, nc = kparams
    B, Dt = text_features.shape
    Di = img_features.shape[1]
    H = w1t.shape[1]

    if tile_b is None:
        tile_b = _pick_tile_b(B)
    B_pad = _round_up(B, tile_b)

    def pad_rows(x):
        if x.shape[0] == B_pad:
            return x            # no-op at aligned training/serving batch sizes
        return jnp.pad(x, ((0, B_pad - x.shape[0]), (0, 0)))

    txt = pad_rows(text_features.astype(jnp.float32))
    img = pad_rows(img_features.astype(jnp.float32))

    grid_steps = B_pad // tile_b
    grid = (grid_steps,)

    def batch_spec(cols):
        return pl.BlockSpec((tile_b, cols), lambda i: (i, 0))

    def resident_spec(shape):
        # constant block index -> stays VMEM-resident across all grid steps
        return pl.BlockSpec(shape, lambda i: (0, 0))

    # Advisory cost estimate so XLA schedules/overlaps this small custom call
    # properly next to the backbone HLOs.
    flops = 2 * B_pad * (Dt + Di) * H + 2 * B_pad * H * OUT_PAD
    bytes_accessed = (
        4 * B_pad * (Dt + Di)                 # f32 features in
        + 2 * ((Dt + Di) * H + H * OUT_PAD)   # bf16 weights
        + 4 * (H + OUT_PAD)                   # f32 biases
        + 4 * B_pad * OUT_PAD)                # f32 padded logits out
    cost = pl.CostEstimate(flops=int(flops), transcendentals=0,
                           bytes_accessed=int(bytes_accessed))

    # Only mark the batch axis parallel when there is actually >1 step to shard.
    dim_sem = ("parallel",) if grid_steps > 1 else ("arbitrary",)

    out_pad = pl.pallas_call(
        fusion_head_kernel,
        out_shape=jax.ShapeDtypeStruct((B_pad, OUT_PAD), jnp.float32),
        grid=grid,
        in_specs=[
            batch_spec(Dt),                 # text features  (tiled on batch)
            batch_spec(Di),                 # image features (tiled on batch)
            resident_spec(w1t.shape),       # W1[:Dt]  (bf16, resident)
            resident_spec(w1i.shape),       # W1[Dt:]  (bf16, resident)
            resident_spec(b1.shape),        # b1       (f32, resident)
            resident_spec(w2p.shape),       # W2 padded to 128 cols (bf16)
            resident_spec(b2p.shape),       # b2 padded (f32)
        ],
        out_specs=pl.BlockSpec((tile_b, OUT_PAD), lambda i: (i, 0)),
        compiler_params=pltpu.CompilerParams(
            dimension_semantics=dim_sem,
            vmem_limit_bytes=32 * 1024 * 1024),
        cost_estimate=cost,
    )(txt, img, w1t, w1i, b1, w2p, b2p)

    # Padded rows/lanes carry relu(b1)@W2+b2 junk; slice before any consumer.
    return out_pad[:B, :nc]


def init_raw_params(key):
    """Matches _init_weights(): Normal(std=0.02) weights, zero biases.

    Stored [in_dim, out_dim] (transpose of the PyTorch nn.Linear layout)."""
    k1, k2 = jax.random.split(key, 2)
    w1 = 0.02 * jax.random.normal(k1, (TEXT_DIM + IMG_DIM, HIDDEN), jnp.float32)
    b1 = jnp.zeros((HIDDEN,), jnp.float32)
    w2 = 0.02 * jax.random.normal(k2, (HIDDEN, NUM_CLASSES), jnp.float32)
    b2 = jnp.zeros((NUM_CLASSES,), jnp.float32)
    return (w1, b1, w2, b2)


def reference_forward(text_features, img_features, raw_params):
    """Plain-JAX f32 reference mirroring the PyTorch forward (concat fusion)."""
    w1, b1, w2, b2 = raw_params
    fused = jnp.concatenate([text_features, img_features], axis=1)
    h = jnp.maximum(fused @ w1 + b1[None, :], 0.0)
    return h @ w2 + b2[None, :]


if __name__ == "__main__":
    key = jax.random.PRNGKey(0)
    k_feat_t, k_feat_i, k_params = jax.random.split(key, 3)

    # Synthetic backbone outputs (see TODO(synk) above).
    text_features = jax.random.normal(k_feat_t, (BATCH, TEXT_DIM), jnp.float32)
    img_features = jax.random.normal(k_feat_i, (BATCH, IMG_DIM), jnp.float32)

    raw_params = init_raw_params(k_params)
    kparams = prepare_params(raw_params, TEXT_DIM)   # one-time weight prep

    logits = early_fusion_forward(text_features, img_features, kparams)
    logits = jax.block_until_ready(logits)

    ref = reference_forward(text_features, img_features, raw_params)
    assert logits.shape == (BATCH, NUM_CLASSES)
    # bf16 weights / bf16 hidden recast with f32 MXU accumulation -> loosened
    # tolerance vs. the f32 reference.
    assert jnp.allclose(logits, ref, atol=1e-2, rtol=1e-2)
    print("KERNEL_OK")
</pallas_src>

<mosaic_0001>
module attributes {stable_mosaic.version = 11 : i64} {
  func.func @fusion_head_kernel(%arg0: i32, %arg1: memref<16x128xf32, #tpu.memory_space<vmem>>, %arg2: memref<16x256xf32, #tpu.memory_space<vmem>>, %arg3: memref<128x512xbf16, #tpu.memory_space<vmem>>, %arg4: memref<256x512xbf16, #tpu.memory_space<vmem>>, %arg5: memref<1x512xf32, #tpu.memory_space<vmem>>, %arg6: memref<512x128xbf16, #tpu.memory_space<vmem>>, %arg7: memref<1x128xf32, #tpu.memory_space<vmem>>, %arg8: memref<16x128xf32, #tpu.memory_space<vmem>>) attributes {dimension_semantics = [#tpu.dimension_semantics<arbitrary>], iteration_bounds = array<i64: 1>, scalar_prefetch = 0 : i64, scratch_operands = 0 : i64, tpu.core_type = #tpu.core_type<tc>, window_params = [{transform_indices = @transform_0, window_bounds = array<i64: 16, 128>}, {transform_indices = @transform_1, window_bounds = array<i64: 16, 256>}, {pipeline_mode = #tpu.pipeline_mode<synchronous>, transform_indices = @transform_2, window_bounds = array<i64: 128, 512>}, {pipeline_mode = #tpu.pipeline_mode<synchronous>, transform_indices = @transform_3, window_bounds = array<i64: 256, 512>}, {pipeline_mode = #tpu.pipeline_mode<synchronous>, transform_indices = @transform_4, window_bounds = array<i64: 1, 512>}, {pipeline_mode = #tpu.pipeline_mode<synchronous>, transform_indices = @transform_5, window_bounds = array<i64: 512, 128>}, {pipeline_mode = #tpu.pipeline_mode<synchronous>, transform_indices = @transform_6, window_bounds = array<i64: 1, 128>}, {transform_indices = @transform_7, window_bounds = array<i64: 16, 128>}]} {
    %c0 = arith.constant 0 : index
    %c0_0 = arith.constant 0 : index
    %0 = vector.load %arg1[%c0, %c0_0] : memref<16x128xf32, #tpu.memory_space<vmem>>, vector<16x128xf32>
    %1 = arith.truncf %0 : vector<16x128xf32> to vector<16x128xbf16>
    %c0_1 = arith.constant 0 : index
    %c0_2 = arith.constant 0 : index
    %2 = vector.load %arg2[%c0_1, %c0_2] : memref<16x256xf32, #tpu.memory_space<vmem>>, vector<16x256xf32>
    %3 = arith.truncf %2 : vector<16x256xf32> to vector<16x256xbf16>
    %c0_3 = arith.constant 0 : index
    %c0_4 = arith.constant 0 : index
    %4 = vector.load %arg3[%c0_3, %c0_4] : memref<128x512xbf16, #tpu.memory_space<vmem>>, vector<128x512xbf16>
    %cst = arith.constant dense<0.000000e+00> : vector<16x512xf32>
    %5 = tpu.matmul %1, %4, %cst {dimension_numbers = #tpu.dot_dimension_numbers<[1], [0], [0], [1], [0, 0, 1, 1], [], []>} : vector<16x128xbf16>, vector<128x512xbf16>, vector<16x512xf32> -> vector<16x512xf32>
    %c0_5 = arith.constant 0 : index
    %c0_6 = arith.constant 0 : index
    %6 = vector.load %arg4[%c0_5, %c0_6] : memref<256x512xbf16, #tpu.memory_space<vmem>>, vector<256x512xbf16>
    %cst_7 = arith.constant dense<0.000000e+00> : vector<16x512xf32>
    %7 = tpu.matmul %3, %6, %cst_7 {dimension_numbers = #tpu.dot_dimension_numbers<[1], [0], [0], [1], [0, 0, 1, 1], [], []>} : vector<16x256xbf16>, vector<256x512xbf16>, vector<16x512xf32> -> vector<16x512xf32>
    %8 = arith.addf %5, %7 : vector<16x512xf32>
    %c0_8 = arith.constant 0 : index
    %c0_9 = arith.constant 0 : index
    %9 = vector.load %arg5[%c0_8, %c0_9] : memref<1x512xf32, #tpu.memory_space<vmem>>, vector<1x512xf32>
    %10 = vector.broadcast %9 : vector<1x512xf32> to vector<16x512xf32>
    %11 = arith.addf %8, %10 : vector<16x512xf32>
    %cst_10 = arith.constant 0.000000e+00 : f32
    %12 = vector.broadcast %cst_10 : f32 to vector<16x512xf32>
    %13 = arith.maximumf %11, %12 : vector<16x512xf32>
    %14 = arith.truncf %13 : vector<16x512xf32> to vector<16x512xbf16>
    %c0_11 = arith.constant 0 : index
    %c0_12 = arith.constant 0 : index
    %15 = vector.load %arg6[%c0_11, %c0_12] : memref<512x128xbf16, #tpu.memory_space<vmem>>, vector<512x128xbf16>
    %cst_13 = arith.constant dense<0.000000e+00> : vector<16x128xf32>
    %16 = tpu.matmul %14, %15, %cst_13 {dimension_numbers = #tpu.dot_dimension_numbers<[1], [0], [0], [1], [0, 0, 1, 1], [], []>} : vector<16x512xbf16>, vector<512x128xbf16>, vector<16x128xf32> -> vector<16x128xf32>
    %c0_14 = arith.constant 0 : index
    %c0_15 = arith.constant 0 : index
    %17 = vector.load %arg7[%c0_14, %c0_15] : memref<1x128xf32, #tpu.memory_space<vmem>>, vector<1x128xf32>
    %18 = vector.broadcast %17 : vector<1x128xf32> to vector<16x128xf32>
    %19 = arith.addf %16, %18 : vector<16x128xf32>
    %c0_16 = arith.constant 0 : index
    %c0_17 = arith.constant 0 : index
    %20 = vector.load %arg8[%c0_16, %c0_17] : memref<16x128xf32, #tpu.memory_space<vmem>>, vector<16x128xf32>
    tpu.vector_store %arg8[%c0_16, %c0_17], %19 {strides = array<i32>} : memref<16x128xf32, #tpu.memory_space<vmem>>, vector<16x128xf32>,
    return
  }
  func.func @transform_0(%arg0: i32) -> (i32, i32) {
    %c0_i32 = arith.constant 0 : i32
    %c0_i32_0 = arith.constant 0 : i32
    return %arg0, %c0_i32 : i32, i32
  }
  func.func @transform_1(%arg0: i32) -> (i32, i32) {
    %c0_i32 = arith.constant 0 : i32
    %c0_i32_0 = arith.constant 0 : i32
    return %arg0, %c0_i32 : i32, i32
  }
  func.func @transform_2(%arg0: i32) -> (i32, i32) {
    %c0_i32 = arith.constant 0 : i32
    %c0_i32_0 = arith.constant 0 : i32
    %c0_i32_1 = arith.constant 0 : i32
    return %c0_i32, %c0_i32_0 : i32, i32
  }
  func.func @transform_3(%arg0: i32) -> (i32, i32) {
    %c0_i32 = arith.constant 0 : i32
    %c0_i32_0 = arith.constant 0 : i32
    %c0_i32_1 = arith.constant 0 : i32
    return %c0_i32, %c0_i32_0 : i32, i32
  }
  func.func @transform_4(%arg0: i32) -> (i32, i32) {
    %c0_i32 = arith.constant 0 : i32
    %c0_i32_0 = arith.constant 0 : i32
    %c0_i32_1 = arith.constant 0 : i32
    return %c0_i32, %c0_i32_0 : i32, i32
  }
  func.func @transform_5(%arg0: i32) -> (i32, i32) {
    %c0_i32 = arith.constant 0 : i32
    %c0_i32_0 = arith.constant 0 : i32
    %c0_i32_1 = arith.constant 0 : i32
    return %c0_i32, %c0_i32_0 : i32, i32
  }
  func.func @transform_6(%arg0: i32) -> (i32, i32) {
    %c0_i32 = arith.constant 0 : i32
    %c0_i32_0 = arith.constant 0 : i32
    %c0_i32_1 = arith.constant 0 : i32
    return %c0_i32, %c0_i32_0 : i32, i32
  }
  func.func @transform_7(%arg0: i32) -> (i32, i32) {
    %c0_i32 = arith.constant 0 : i32
    %c0_i32_0 = arith.constant 0 : i32
    return %arg0, %c0_i32 : i32, i32
  }
}

</mosaic_0001>

<bundles_post_ra>
// kernel: tpu_custom_call.1
= control target key start
LH: loop header
LB: loop body
LE: loop exit
PB: predicated region body
PF: predicated region fallthrough
CT: control target
= control target key end

     0   :  { %12 = vsyncpa [#allocation3], 0  ;;  %s1917_s0 = inlined_call_operand.hbm [shape: f32[16,128], index: 0, kind: input, shape index: {}]   ;;  %s1918_s1 = inlined_call_operand.hbm [shape: f32[16,256], index: 1, kind: input, shape index: {}]   ;;  %s1919_s2 = inlined_call_operand.hbm [shape: bf16[128,512], index: 2, kind: input, shape index: {}]   ;;  %s1920_s3 = inlined_call_operand.hbm [shape: bf16[256,512], index: 3, kind: input, shape index: {}]   ;;  %s1921_s4 = inlined_call_operand.vmem [shape: f32[1,512], index: 4, kind: input, shape index: {}]   ;;  %s1922_s5 = inlined_call_operand.hbm [shape: bf16[512,128], index: 5, kind: input, shape index: {}]   ;;  %s1923_s6 = inlined_call_operand.vmem [shape: f32[1,128], index: 6, kind: input, shape index: {}]   ;;  %s1924_s7 = inlined_call_operand.hbm [shape: f32[16,128], index: 7, kind: output, shape index: {}]  }
   0x1   :  { %13 = vsyncpa [#allocation6], 0 }
   0x2   :  { %14 = vsyncpa [#allocation9], 0 }
   0x3   :  { %15 = vsyncpa [#allocation4], 0  ;;  %s1771_s24 = smov [#allocation5]   ;;  %s1631_s28 = scalar_lea.hbm %s1918_s1, 512 }
   0x4   :  { %s33_s25 = sshll.u32 %s1771_s24, 4  ;;  %p1632_p0 = scmp.ne.s32.totalorder %s1918_s1, %s1631_s28  ;;  %s34_s25 = int_to_ptr.vmem [resolvable:$true] %s33_s25 }
   0x5   :  { %p1635_p1 = scmp.lt.u32.totalorder %s1631_s28, %s1918_s1 }
   0x7   :  { %p1637_p2 = pnand %p1635_p1, %p1632_p0 }
   0x9   :  { %1640 = shalt.err (!%p1637_p2)
}
   0xa   :  { %s1641_s10 = scalar_lea.vmem %s34_s25, 512  ;;  %p1646_p4 = scmp.lt.s32.totalorder %s34_s25, %s34_s25 }
   0xb   :  { %p1642_p3 = scmp.ne.s32.totalorder %s34_s25, %s1641_s10  ;;  %p1647_p5 = scmp.lt.s32.totalorder %s1641_s10, %s1641_s10 }
   0xd   :  { %p1648_p6 = por %p1647_p5, %p1646_p4 }
   0xf   :  { %p1649_p7 = pnand %p1648_p6, %p1642_p3 }
  0x11   :  { %1652 = shalt.err (!%p1649_p7)
}
  0x12   :  { %s1772_s11 = smov 256   ;;  %s1773_s12 = smov 16  }
  0x13   :  { %39 = dma.hbm_to_vmem [thread:$0]  %s1918_s1, 512, %s34_s25, [#allocation6], %s1772_s11, %s1772_s11, %s1773_s12  }
  0x14   :  { %s1774_s15 = smov [#allocation8]   ;;  %s1775_s17 = smov [#allocation2]  }
  0x15   :  { %s57_s16 = sshll.u32 %s1774_s15, 4  ;;  %s21_s18 = sshll.u32 %s1775_s17, 4  ;;  %s58_s16 = int_to_ptr.vmem [resolvable:$true] %s57_s16  ;;  %s22_s18 = int_to_ptr.vmem [resolvable:$true] %s21_s18 }
  0x16   :  { %s1653_s21 = scalar_lea.hbm %s1920_s3, 8192 }
  0x17   :  { %p1654_p8 = scmp.ne.s32.totalorder %s1920_s3, %s1653_s21  ;;  %p1657_p9 = scmp.lt.u32.totalorder %s1653_s21, %s1920_s3 }
  0x19   :  { %p1659_p10 = pnand %p1657_p9, %p1654_p8 }
  0x1b   :  { %1662 = shalt.err (!%p1659_p10)
}
  0x1c   :  { %s1663_s1 = scalar_lea.vmem %s58_s16, 8192  ;;  %p1668_p12 = scmp.lt.s32.totalorder %s58_s16, %s58_s16 }
  0x1d   :  { %p1664_p11 = scmp.ne.s32.totalorder %s58_s16, %s1663_s1  ;;  %p1669_p13 = scmp.lt.s32.totalorder %s1663_s1, %s1663_s1 }
  0x1f   :  { %p1670_p0 = por %p1669_p13, %p1668_p12 }
  0x21   :  { %p1671_p1 = pnand %p1670_p0, %p1664_p11 }
  0x23   :  { %1674 = shalt.err (!%p1671_p1)
}
  0x24   :  { %63 = dma.hbm_to_vmem [thread:$0]  %s1920_s3, 8192, %s58_s16, [#allocation9], %s1772_s11, %s1772_s11, %s1773_s12  }
  0x25   :  { %s1675_s30 = scalar_lea.hbm %s1917_s0, 256 }
  0x26   :  { %p1676_p2 = scmp.ne.s32.totalorder %s1917_s0, %s1675_s30  ;;  %p1679_p3 = scmp.lt.u32.totalorder %s1675_s30, %s1917_s0 }
  0x28   :  { %p1681_p4 = pnand %p1679_p3, %p1676_p2 }
  0x2a   :  { %1684 = shalt.err (!%p1681_p4)
}
  0x2b   :  { %s1685_s14 = scalar_lea.vmem %s22_s18, 256  ;;  %p1690_p6 = scmp.lt.s32.totalorder %s22_s18, %s22_s18 }
  0x2c   :  { %p1686_p5 = scmp.ne.s32.totalorder %s22_s18, %s1685_s14  ;;  %p1691_p7 = scmp.lt.s32.totalorder %s1685_s14, %s1685_s14 }
  0x2e   :  { %p1692_p8 = por %p1691_p7, %p1690_p6 }
  0x30   :  { %p1693_p9 = pnand %p1692_p8, %p1686_p5 }
  0x32   :  { %1696 = shalt.err (!%p1693_p9)
}
  0x33   :  { %s1776_s3 = smov 128   ;;  %s1777_s15 = smov 8  }
  0x34   :  { %27 = dma.hbm_to_vmem [thread:$0]  %s1917_s0, 256, %s22_s18, [#allocation3], %s1776_s3, %s1776_s3, %s1777_s15  }
  0x35   :  { %s1778_s19 = smov [#allocation7]   ;;  %s1779_s21 = smov [#allocation10]  }
  0x36   :  { %s45_s20 = sshll.u32 %s1778_s19, 4  ;;  %s71_s22 = sshll.u32 %s1779_s21, 4  ;;  %s46_s20 = int_to_ptr.vmem [resolvable:$true] %s45_s20  ;;  %s72_s22 = int_to_ptr.vmem [resolvable:$true] %s71_s22 }
  0x37   :  { %s1697_s26 = scalar_lea.hbm %s1919_s2, 4096 }
  0x38   :  { %p1698_p10 = scmp.ne.s32.totalorder %s1919_s2, %s1697_s26  ;;  %p1701_p11 = scmp.lt.u32.totalorder %s1697_s26, %s1919_s2 }
  0x3a   :  { %p1703_p12 = pnand %p1701_p11, %p1698_p10 }
  0x3c   :  { %1706 = shalt.err (!%p1703_p12)
}
  0x3d   :  { %s1707_s0 = scalar_lea.vmem %s46_s20, 4096  ;;  %p1712_p0 = scmp.lt.s32.totalorder %s46_s20, %s46_s20 }
  0x3e   :  { %p1708_p13 = scmp.ne.s32.totalorder %s46_s20, %s1707_s0  ;;  %p1713_p1 = scmp.lt.s32.totalorder %s1707_s0, %s1707_s0 }
  0x40   :  { %p1714_p2 = por %p1713_p1, %p1712_p0 }
  0x42   :  { %p1715_p3 = pnand %p1714_p2, %p1708_p13 }
  0x44   :  { %1718 = shalt.err (!%p1715_p3)
}
  0x45   :  { %51 = dma.hbm_to_vmem [thread:$0]  %s1919_s2, 4096, %s46_s20, [#allocation6], %s1772_s11, %s1772_s11, %s1773_s12  }
  0x46   :  { %s1719_s9 = scalar_lea.hbm %s1922_s5, 4096 }
  0x47   :  { %p1720_p4 = scmp.ne.s32.totalorder %s1922_s5, %s1719_s9  ;;  %p1723_p5 = scmp.lt.u32.totalorder %s1719_s9, %s1922_s5 }
  0x49   :  { %p1725_p6 = pnand %p1723_p5, %p1720_p4 }
  0x4b   :  { %1728 = shalt.err (!%p1725_p6)
}
  0x4c   :  { %s1729_s17 = scalar_lea.vmem %s72_s22, 4096  ;;  %p1734_p8 = scmp.lt.s32.totalorder %s72_s22, %s72_s22 }
  0x4d   :  { %p1730_p7 = scmp.ne.s32.totalorder %s72_s22, %s1729_s17  ;;  %p1735_p9 = scmp.lt.s32.totalorder %s1729_s17, %s1729_s17 }
  0x4f   :  { %p1736_p10 = por %p1735_p9, %p1734_p8 }
  0x51   :  { %p1737_p11 = pnand %p1736_p10, %p1730_p7 }
  0x53   :  { %1740 = shalt.err (!%p1737_p11)
}
  0x54   :  { %s1780_s2 = smov 64   ;;  %s1781_s11 = smov 4  }
  0x55   :  { %77 = dma.hbm_to_vmem [thread:$0]  %s1922_s5, 4096, %s72_s22, [#allocation9], %s1780_s2, %s1780_s2, %s1781_s11  }
  0x56   :  { %1763 = dma.done.wait [#allocation3], 256  }
  0x57   :  { %1764 = vsyncadd [#allocation3], 4294967040 }
  0x58   :  { %1765 = dma.done.wait [#allocation6], 4608  }
  0x59   :  { %1766 = vsyncadd [#allocation6], 4294962688 }
  0x5a   :  { %1767 = dma.done.wait [#allocation9], 12288  }
  0x5b   :  { %1768 = vsyncadd [#allocation9], 4294955008  ;;  %v1455_v0 = vld [vmem:[#allocation8 + $0x4] ss:$16 sps:$4 sm:$0xff]   ;;  %v1457_v1 = vld [vmem:[#allocation8 + $0xc] ss:$16 sps:$4 sm:$0xff]  }
  0x5c   :  { %521 = vmatprep.subr.bf16.mxu0 %v1455_v0  ;;  %v1459_v2 = vld [vmem:[#allocation8] ss:$16 sps:$4 sm:$0xff]   ;;  %v1460_v3 = vld [vmem:[#allocation8 + $0x8] ss:$16 sps:$4 sm:$0xff]   ;;  %564 = vmatprep.subr.bf16.mxu1 %v1457_v1  ;;  %v1461_v4 = vld [vmem:[#allocation8 + $0x24] ss:$16 sps:$4 sm:$0xff]  }
  0x5d   :  { %522 = vmatpush1.bf16.msra.mxu0 %v1459_v2  ;;  %565 = vmatpush1.bf16.msra.mxu1 %v1460_v3  ;;  %v1463_v5 = vld [vmem:[#allocation8 + $0x2c] ss:$16 sps:$4 sm:$0xff]   ;;  %v1465_v6 = vld [vmem:[#allocation8 + $0x20] ss:$16 sps:$4 sm:$0xff]   ;;  %v1466_v7 = vld [vmem:[#allocation8 + $0x28] ss:$16 sps:$4 sm:$0xff]  }
  0x5e   :  { %523 = vmatprep.subr.bf16.mxu0 %v1461_v4  ;;  %566 = vmatprep.subr.bf16.mxu1 %v1463_v5  ;;  %v1467_v8 = vld [vmem:[#allocation8 + $0x44] ss:$16 sps:$4 sm:$0xff]   ;;  %v1469_v9 = vld [vmem:[#allocation8 + $0x4c] ss:$16 sps:$4 sm:$0xff]   ;;  %v1471_v10 = vld [vmem:[#allocation8 + $0x40] ss:$16 sps:$4 sm:$0xff]  }
  0x5f   :  { %v1472_v11 = vld [vmem:[#allocation8 + $0x48] ss:$16 sps:$4 sm:$0xff]   ;;  %v1473_v12 = vld [vmem:[#allocation8 + $0x64] ss:$16 sps:$4 sm:$0xff]   ;;  %v1475_v13 = vld [vmem:[#allocation8 + $0x6c] ss:$16 sps:$4 sm:$0xff]  }
  0x60   :  { %v1477_v14 = vld [vmem:[#allocation8 + $0x60] ss:$16 sps:$4 sm:$0xff]   ;;  %v1478_v15 = vld [vmem:[#allocation8 + $0x68] ss:$16 sps:$4 sm:$0xff]   ;;  %v1479_v16 = vld [vmem:[#allocation8 + $0x84] ss:$16 sps:$4 sm:$0xff]  }
  0x61   :  { %524 = vmatpush1.bf16.msra.mxu0 %v1465_v6  ;;  %567 = vmatpush1.bf16.msra.mxu1 %v1466_v7  ;;  %v1481_v17 = vld [vmem:[#allocation8 + $0x8c] ss:$16 sps:$4 sm:$0xff]   ;;  %v1483_v18 = vld [vmem:[#allocation8 + $0x80] ss:$16 sps:$4 sm:$0xff]   ;;  %v1484_v19 = vld [vmem:[#allocation8 + $0x88] ss:$16 sps:$4 sm:$0xff]  }
  0x62   :  { %525 = vmatprep.subr.bf16.mxu0 %v1467_v8  ;;  %568 = vmatprep.subr.bf16.mxu1 %v1469_v9  ;;  %v1485_v20 = vld [vmem:[#allocation8 + $0xa4] ss:$16 sps:$4 sm:$0xff]   ;;  %v1487_v21 = vld [vmem:[#allocation8 + $0xac] ss:$16 sps:$4 sm:$0xff]   ;;  %v1489_v22 = vld [vmem:[#allocation8 + $0xa0] ss:$16 sps:$4 sm:$0xff]  }
  0x63   :  { %v1490_v23 = vld [vmem:[#allocation8 + $0xa8] ss:$16 sps:$4 sm:$0xff]   ;;  %v1491_v24 = vld [vmem:[#allocation8 + $0xc4] ss:$16 sps:$4 sm:$0xff]   ;;  %v1493_v25 = vld [vmem:[#allocation8 + $0xcc] ss:$16 sps:$4 sm:$0xff]  }
  0x64   :  { %v1495_v26 = vld [vmem:[#allocation8 + $0xc0] ss:$16 sps:$4 sm:$0xff]   ;;  %v1496_v27 = vld [vmem:[#allocation8 + $0xc8] ss:$16 sps:$4 sm:$0xff]   ;;  %v1497_v28 = vld [vmem:[#allocation8 + $0xe4] ss:$16 sps:$4 sm:$0xff]  }
  0x65   :  { %526 = vmatpush1.bf16.msra.mxu0 %v1471_v10  ;;  %569 = vmatpush1.bf16.msra.mxu1 %v1472_v11  ;;  %v1499_v29 = vld [vmem:[#allocation8 + $0xec] ss:$16 sps:$4 sm:$0xff]   ;;  %v1501_v30 = vld [vmem:[#allocation8 + $0xe0] ss:$16 sps:$4 sm:$0xff]   ;;  %v1502_v31 = vld [vmem:[#allocation8 + $0xe8] ss:$16 sps:$4 sm:$0xff]  }
  0x66   :  { %527 = vmatprep.subr.bf16.mxu0 %v1473_v12  ;;  %570 = vmatprep.subr.bf16.mxu1 %v1475_v13  ;;  %v1503_v32 = vld [vmem:[#allocation8 + $0x104] ss:$16 sps:$4 sm:$0xff]   ;;  %v1505_v33 = vld [vmem:[#allocation8 + $0x10c] ss:$16 sps:$4 sm:$0xff]   ;;  %v1507_v34 = vld [vmem:[#allocation8 + $0x100] ss:$16 sps:$4 sm:$0xff]  }
  0x67   :  { %v1508_v35 = vld [vmem:[#allocation8 + $0x108] ss:$16 sps:$4 sm:$0xff]   ;;  %v1509_v36 = vld [vmem:[#allocation8 + $0x124] ss:$16 sps:$4 sm:$0xff]   ;;  %v1511_v37 = vld [vmem:[#allocation8 + $0x12c] ss:$16 sps:$4 sm:$0xff]  }
  0x68   :  { %v1513_v38 = vld [vmem:[#allocation8 + $0x120] ss:$16 sps:$4 sm:$0xff]   ;;  %v1514_v39 = vld [vmem:[#allocation8 + $0x128] ss:$16 sps:$4 sm:$0xff]   ;;  %v1515_v40 = vld [vmem:[#allocation8 + $0x144] ss:$16 sps:$4 sm:$0xff]  }
  0x69   :  { %528 = vmatpush1.bf16.msra.mxu0 %v1477_v14  ;;  %571 = vmatpush1.bf16.msra.mxu1 %v1478_v15  ;;  %v1517_v41 = vld [vmem:[#allocation8 + $0x14c] ss:$16 sps:$4 sm:$0xff]   ;;  %v1519_v42 = vld [vmem:[#allocation8 + $0x140] ss:$16 sps:$4 sm:$0xff]   ;;  %v1520_v43 = vld [vmem:[#allocation8 + $0x148] ss:$16 sps:$4 sm:$0xff]  }
  0x6a   :  { %529 = vmatprep.subr.bf16.mxu0 %v1479_v16  ;;  %572 = vmatprep.subr.bf16.mxu1 %v1481_v17  ;;  %v1521_v44 = vld [vmem:[#allocation8 + $0x164] ss:$16 sps:$4 sm:$0xff]   ;;  %v1523_v45 = vld [vmem:[#allocation8 + $0x16c] ss:$16 sps:$4 sm:$0xff]   ;;  %v1525_v48 = vld [vmem:[#allocation8 + $0x160] ss:$16 sps:$4 sm:$0xff]  }
  0x6b   :  { %v100_v46 = vld [vmem:[#allocation5 + $0x8] sm:$0xff]  ;;  %v102_v47 = vld [vmem:[#allocation5 + $0x18] sm:$0xff]  ;;  %v1527_v51 = vld [vmem:[#allocation8 + $0x184] ss:$16 sps:$4 sm:$0xff]   ;;  %v1782_v17 = vmov 0   ;;  %s1783_s22 = smov [#allocation11]  }
  0x6c   :  { %v1526_v49 = vld [vmem:[#allocation8 + $0x168] ss:$16 sps:$4 sm:$0xff]   ;;  %v104_v50 = vpack.c.bf16 %v102_v47, %v100_v46  ;;  %v1529_v52 = vld [vmem:[#allocation8 + $0x18c] ss:$16 sps:$4 sm:$0xff]   ;;  %v1531_v53 = vld [vmem:[#allocation8 + $0x180] ss:$16 sps:$4 sm:$0xff]  }
  0x6d   :  { %530 = vmatpush1.bf16.msra.mxu0 %v1483_v18  ;;  %573 = vmatpush1.bf16.msra.mxu1 %v1484_v19  ;;  %v1532_v54 = vld [vmem:[#allocation8 + $0x188] ss:$16 sps:$4 sm:$0xff]   ;;  %v1533_v55 = vld [vmem:[#allocation8 + $0x1a4] ss:$16 sps:$4 sm:$0xff]   ;;  %v1535_v56 = vld [vmem:[#allocation8 + $0x1ac] ss:$16 sps:$4 sm:$0xff]  }
  0x6e   :  { %531 = vmatprep.subr.bf16.mxu0 %v1485_v20  ;;  %574 = vmatprep.subr.bf16.mxu1 %v1487_v21  ;;  %v1537_v57 = vld [vmem:[#allocation8 + $0x1a0] ss:$16 sps:$4 sm:$0xff]   ;;  %v1538_v58 = vld [vmem:[#allocation8 + $0x1a8] ss:$16 sps:$4 sm:$0xff]   ;;  %v1539_v59 = vld [vmem:[#allocation8 + $0x1c4] ss:$16 sps:$4 sm:$0xff]  }
  0x6f   :  { %553 = vmatprep.mubr.bf16.mxu0 %v104_v50  ;;  %596 = vmatprep.mubr.bf16.mxu1 %v104_v50  ;;  %v1541_v60 = vld [vmem:[#allocation8 + $0x1cc] ss:$16 sps:$4 sm:$0xff]   ;;  %v1543_v61 = vld [vmem:[#allocation8 + $0x1c0] ss:$16 sps:$4 sm:$0xff]   ;;  %v1544_v62 = vld [vmem:[#allocation8 + $0x1c8] ss:$16 sps:$4 sm:$0xff]  }
  0x70   :  { %v1545_v63 = vld [vmem:[#allocation8 + $0x1e4] ss:$16 sps:$4 sm:$0xff]   ;;  %v1547_v0 = vld [vmem:[#allocation8 + $0x1ec] ss:$16 sps:$4 sm:$0xff]   ;;  %v1549_v1 = vld [vmem:[#allocation8 + $0x1e0] ss:$16 sps:$4 sm:$0xff]  }
  0x71   :  { %532 = vmatpush1.bf16.msra.mxu0 %v1489_v22  ;;  %575 = vmatpush1.bf16.msra.mxu1 %v1490_v23  ;;  %v1550_v2 = vld [vmem:[#allocation8 + $0x1e8] ss:$16 sps:$4 sm:$0xff]   ;;  %v1553_v3 = vld [vmem:[#allocation7 + $0x4] ss:$16 sps:$4 sm:$0xff]   ;;  %v1556_v6 = vld [vmem:[#allocation7 + $0xc] ss:$16 sps:$4 sm:$0xff]  }
  0x72   :  { %533 = vmatprep.subr.bf16.mxu0 %v1491_v24  ;;  %576 = vmatprep.subr.bf16.mxu1 %v1493_v25  ;;  %v99_v4 = vld [vmem:[#allocation5] sm:$0xff]  ;;  %v101_v5 = vld [vmem:[#allocation5 + $0x10] sm:$0xff]  ;;  %v1554_v9 = vld [vmem:[#allocation7 + $0x8] ss:$16 sps:$4 sm:$0xff]   ;;  %s1247_s23 = sshll.u32 %s1783_s22, 4  ;;  %s1248_s23 = int_to_ptr.vmem [resolvable:$true] %s1247_s23 }
  0x73   :  { %v1551_v7 = vld [vmem:[#allocation7] ss:$16 sps:$4 sm:$0xff]   ;;  %v103_v8 = vpack.c.bf16 %v101_v5, %v99_v4  ;;  %v1559_v10 = vld [vmem:[#allocation7 + $0x24] ss:$16 sps:$4 sm:$0xff]   ;;  %v1562_v11 = vld [vmem:[#allocation7 + $0x2c] ss:$16 sps:$4 sm:$0xff]   ;;  %p1746_p13 = scmp.lt.s32.totalorder %s1248_s23, %s1248_s23 }
  0x74   :  { %v1557_v12 = vld [vmem:[#allocation7 + $0x20] ss:$16 sps:$4 sm:$0xff]   ;;  %v1560_v13 = vld [vmem:[#allocation7 + $0x28] ss:$16 sps:$4 sm:$0xff]   ;;  %v1565_v14 = vld [vmem:[#allocation7 + $0x44] ss:$16 sps:$4 sm:$0xff]  }
  0x75   :  { %534 = vmatpush1.bf16.msra.mxu0 %v1495_v26  ;;  %577 = vmatpush1.bf16.msra.mxu1 %v1496_v27  ;;  %v1568_v15 = vld [vmem:[#allocation7 + $0x4c] ss:$16 sps:$4 sm:$0xff]   ;;  %v1563_v16 = vld [vmem:[#allocation7 + $0x40] ss:$16 sps:$4 sm:$0xff]   ;;  %v1566_v18 = vld [vmem:[#allocation7 + $0x48] ss:$16 sps:$4 sm:$0xff]  }
  0x76   :  { %535 = vmatprep.subr.bf16.mxu0 %v1497_v28  ;;  %578 = vmatprep.subr.bf16.mxu1 %v1499_v29  ;;  %v1571_v19 = vld [vmem:[#allocation7 + $0x64] ss:$16 sps:$4 sm:$0xff]   ;;  %v1574_v20 = vld [vmem:[#allocation7 + $0x6c] ss:$16 sps:$4 sm:$0xff]   ;;  %v1569_v21 = vld [vmem:[#allocation7 + $0x60] ss:$16 sps:$4 sm:$0xff]  }
  0x77   :  { %v1572_v22 = vld [vmem:[#allocation7 + $0x68] ss:$16 sps:$4 sm:$0xff]   ;;  %v1577_v23 = vld [vmem:[#allocation7 + $0x84] ss:$16 sps:$4 sm:$0xff]   ;;  %v1580_v24 = vld [vmem:[#allocation7 + $0x8c] ss:$16 sps:$4 sm:$0xff]  }
  0x78   :  { %v1575_v25 = vld [vmem:[#allocation7 + $0x80] ss:$16 sps:$4 sm:$0xff]   ;;  %v1578_v26 = vld [vmem:[#allocation7 + $0x88] ss:$16 sps:$4 sm:$0xff]   ;;  %v1583_v27 = vld [vmem:[#allocation7 + $0xa4] ss:$16 sps:$4 sm:$0xff]  }
  0x79   :  { %536 = vmatpush1.bf16.msra.mxu0 %v1501_v30  ;;  %579 = vmatpush1.bf16.msra.mxu1 %v1502_v31  ;;  %v1586_v28 = vld [vmem:[#allocation7 + $0xac] ss:$16 sps:$4 sm:$0xff]   ;;  %v1581_v29 = vld [vmem:[#allocation7 + $0xa0] ss:$16 sps:$4 sm:$0xff]   ;;  %v1584_v30 = vld [vmem:[#allocation7 + $0xa8] ss:$16 sps:$4 sm:$0xff]  }
  0x7a   :  { %537 = vmatprep.subr.bf16.mxu0 %v1503_v32  ;;  %580 = vmatprep.subr.bf16.mxu1 %v1505_v33  ;;  %v1589_v31 = vld [vmem:[#allocation7 + $0xc4] ss:$16 sps:$4 sm:$0xff]   ;;  %v1592_v32 = vld [vmem:[#allocation7 + $0xcc] ss:$16 sps:$4 sm:$0xff]   ;;  %v1587_v33 = vld [vmem:[#allocation7 + $0xc0] ss:$16 sps:$4 sm:$0xff]  }
  0x7b   :  { %v1603_v46 = vld [vmem:[#allocation10 + $0x48] sm:$0xff]   ;;  %v1607_v50 = vld [vmem:[#allocation10 + $0x50] sm:$0xff]  }
  0x7c   :  { %v1604_v47 = vld [vmem:[#allocation10 + $0xc8] sm:$0xff]   ;;  %v1625_v4 = vld [vmem:[#allocation10 + $0x30] sm:$0xff]  }
  0x7d   :  { %538 = vmatpush1.bf16.msra.mxu0 %v1507_v34  ;;  %581 = vmatpush1.bf16.msra.mxu1 %v1508_v35  ;;  %v1590_v34 = vld [vmem:[#allocation7 + $0xc8] ss:$16 sps:$4 sm:$0xff]   ;;  %v1595_v35 = vld [vmem:[#allocation7 + $0xe4] ss:$16 sps:$4 sm:$0xff]  }
  0x7e   :  { %539 = vmatprep.subr.bf16.mxu0 %v1509_v36  ;;  %582 = vmatprep.subr.bf16.mxu1 %v1511_v37  ;;  %v1598_v36 = vld [vmem:[#allocation7 + $0xec] ss:$16 sps:$4 sm:$0xff]   ;;  %v1593_v37 = vld [vmem:[#allocation7 + $0xe0] ss:$16 sps:$4 sm:$0xff]  }
  0x7f   :  { %v1626_v5 = vld [vmem:[#allocation10 + $0xb0] sm:$0xff]  }
  0x81   :  { %540 = vmatpush1.bf16.msra.mxu0 %v1513_v38  ;;  %583 = vmatpush1.bf16.msra.mxu1 %v1514_v39  ;;  %v1596_v38 = vld [vmem:[#allocation7 + $0xe8] ss:$16 sps:$4 sm:$0xff]   ;;  %v96_v39 = vld [vmem:[#allocation2] sm:$0xff] }
  0x82   :  { %541 = vmatprep.subr.bf16.mxu0 %v1515_v40  ;;  %584 = vmatprep.subr.bf16.mxu1 %v1517_v41  ;;  %v97_v40 = vld [vmem:[#allocation2 + $0x8] sm:$0xff]  ;;  %v1599_v41 = vld [vmem:[#allocation10 + $0x40] sm:$0xff]  }
  0x85   :  { %542 = vmatpush1.bf16.msra.mxu0 %v1519_v42  ;;  %585 = vmatpush1.bf16.msra.mxu1 %v1520_v43  ;;  %v1600_v42 = vld [vmem:[#allocation10 + $0xc0] sm:$0xff]   ;;  %v98_v43 = vpack.c.bf16 %v97_v40, %v96_v39 }
  0x86   :  { %543 = vmatprep.subr.bf16.mxu0 %v1521_v44  ;;  %586 = vmatprep.subr.bf16.mxu1 %v1523_v45  ;;  %v1601_v44 = vld [vmem:[#allocation10] sm:$0xff]  }
  0x87   :  { %v1602_v45 = vld [vmem:[#allocation10 + $0x80] sm:$0xff]  }
  0x89   :  { %544 = vmatpush1.bf16.msra.mxu0 %v1525_v48  ;;  %587 = vmatpush1.bf16.msra.mxu1 %v1526_v49  ;;  %v1605_v48 = vld [vmem:[#allocation10 + $0x8] sm:$0xff]  }
  0x8a   :  { %545 = vmatprep.subr.bf16.mxu0 %v1527_v51  ;;  %588 = vmatprep.subr.bf16.mxu1 %v1529_v52  ;;  %v1606_v49 = vld [vmem:[#allocation10 + $0x88] sm:$0xff]   ;;  %v1608_v51 = vld [vmem:[#allocation10 + $0xd0] sm:$0xff]  }
  0x8b   :  { %v1609_v52 = vld [vmem:[#allocation10 + $0x10] sm:$0xff]  }
  0x8d   :  { %546 = vmatpush1.bf16.msra.mxu0 %v1531_v53  ;;  %589 = vmatpush1.bf16.msra.mxu1 %v1532_v54  ;;  %v1610_v53 = vld [vmem:[#allocation10 + $0x90] sm:$0xff]   ;;  %v1611_v54 = vld [vmem:[#allocation10 + $0x58] sm:$0xff]  }
  0x8e   :  { %547 = vmatprep.subr.bf16.mxu0 %v1533_v55  ;;  %590 = vmatprep.subr.bf16.mxu1 %v1535_v56  ;;  %v1612_v55 = vld [vmem:[#allocation10 + $0xd8] sm:$0xff]  }
  0x8f   :  { %v1613_v56 = vld [vmem:[#allocation10 + $0x18] sm:$0xff]  }
  0x91   :  { %548 = vmatpush1.bf16.msra.mxu0 %v1537_v57  ;;  %591 = vmatpush1.bf16.msra.mxu1 %v1538_v58  ;;  %v1614_v57 = vld [vmem:[#allocation10 + $0x98] sm:$0xff]   ;;  %v1615_v58 = vld [vmem:[#allocation10 + $0x60] sm:$0xff]  }
  0x92   :  { %549 = vmatprep.subr.bf16.mxu0 %v1539_v59  ;;  %592 = vmatprep.subr.bf16.mxu1 %v1541_v60  ;;  %v1616_v59 = vld [vmem:[#allocation10 + $0xe0] sm:$0xff]  }
  0x93   :  { %v1617_v60 = vld [vmem:[#allocation10 + $0x20] sm:$0xff]  }
  0x95   :  { %550 = vmatpush1.bf16.msra.mxu0 %v1543_v61  ;;  %593 = vmatpush1.bf16.msra.mxu1 %v1544_v62  ;;  %v1618_v61 = vld [vmem:[#allocation10 + $0xa0] sm:$0xff]   ;;  %v1619_v62 = vld [vmem:[#allocation10 + $0x68] sm:$0xff]  }
  0x96   :  { %551 = vmatprep.subr.bf16.mxu0 %v1545_v63  ;;  %594 = vmatprep.subr.bf16.mxu1 %v1547_v0  ;;  %v1620_v63 = vld [vmem:[#allocation10 + $0xe8] sm:$0xff]  }
  0x97   :  { %v1621_v0 = vld [vmem:[#allocation10 + $0x28] sm:$0xff]  }
  0x99   :  { %552 = vmatpush1.bf16.msra.mxu0 %v1549_v1  ;;  %595 = vmatpush1.bf16.msra.mxu1 %v1550_v2  ;;  %v1622_v1 = vld [vmem:[#allocation10 + $0xa8] sm:$0xff]   ;;  %v1623_v2 = vld [vmem:[#allocation10 + $0x70] sm:$0xff]  }
  0x9a   :  { %767 = vmatprep.subr.bf16.mxu0 %v1553_v3  ;;  %810 = vmatprep.subr.bf16.mxu1 %v1556_v6  ;;  %v1624_v3 = vld [vmem:[#allocation10 + $0xf0] sm:$0xff]   ;;  %v1627_v6 = vld [vmem:[#allocation10 + $0x78] sm:$0xff]  }
  0x9c   :  { %554 = vmatmul.mubr.bf16.vlgmr.msra.gmra.mrb[0].mxu0 %v103_v8  ;;  %597 = vmatmul.mubr.bf16.vlgmr.msra.gmra.mrb[0].mxu1 %v103_v8  ;;  %v1629_v8 = vld [vmem:[#allocation10 + $0x38] sm:$0xff]  }
  0x9d   :  { %768 = vmatpush1.bf16.msra.mxu0 %v1551_v7  ;;  %811 = vmatpush1.bf16.msra.mxu1 %v1554_v9  ;;  %v1628_v7 = vld [vmem:[#allocation10 + $0xf8] sm:$0xff]  }
  0x9e   :  { %769 = vmatprep.subr.bf16.mxu0 %v1559_v10  ;;  %812 = vmatprep.subr.bf16.mxu1 %v1562_v11  ;;  %v1630_v9 = vld [vmem:[#allocation10 + $0xb8] sm:$0xff]   ;;  %v855_v10 = vlaneseq }
  0x9f   :  { %799 = vmatprep.mubr.bf16.mxu0 %v1782_v17  ;;  %842 = vmatprep.mubr.bf16.mxu1 %v1782_v17 }
  0xa0   :  { %v856_v11 = vshrl.u32 %v855_v10, 7 }
  0xa1   :  { %770 = vmatpush1.bf16.msra.mxu0 %v1557_v12  ;;  %813 = vmatpush1.bf16.msra.mxu1 %v1560_v13 }
  0xa2   :  { %771 = vmatprep.subr.bf16.mxu0 %v1565_v14  ;;  %814 = vmatprep.subr.bf16.mxu1 %v1568_v15  ;;  %v857_v12 = vsub.s32 0, %v856_v11  ;;  %v865_v13 = vsub.s32 2, %v856_v11  ;;  %v853_v14 = vld [vmem:[%s1921_s4] sm:$0xf]  ;;  %v861_v15 = vsub.s32 1, %v856_v11 }
  0xa4   :  { %v858_v17 = vrot.slane %v853_v14, %v857_v12 }
  0xa5   :  { %772 = vmatpush1.bf16.msra.mxu0 %v1563_v16  ;;  %815 = vmatpush1.bf16.msra.mxu1 %v1566_v18  ;;  %v869_v16 = vsub.s32 3, %v856_v11  ;;  %v866_v18 = vrot.slane %v853_v14, %v865_v13 }
  0xa6   :  { %773 = vmatprep.subr.bf16.mxu0 %v1571_v19  ;;  %816 = vmatprep.subr.bf16.mxu1 %v1574_v20  ;;  %v862_v19 = vrot.slane %v853_v14, %v861_v15 }
  0xa7   :  { %v870_v20 = vrot.slane %v853_v14, %v869_v16 }
  0xa9   :  { %774 = vmatpush1.bf16.msra.mxu0 %v1569_v21  ;;  %817 = vmatpush1.bf16.msra.mxu1 %v1572_v22 }
  0xaa   :  { %775 = vmatprep.subr.bf16.mxu0 %v1577_v23  ;;  %818 = vmatprep.subr.bf16.mxu1 %v1580_v24 }
  0xad   :  { %776 = vmatpush1.bf16.msra.mxu0 %v1575_v25  ;;  %819 = vmatpush1.bf16.msra.mxu1 %v1578_v26 }
  0xae   :  { %777 = vmatprep.subr.bf16.mxu0 %v1583_v27  ;;  %820 = vmatprep.subr.bf16.mxu1 %v1586_v28 }
  0xb1   :  { %778 = vmatpush1.bf16.msra.mxu0 %v1581_v29  ;;  %821 = vmatpush1.bf16.msra.mxu1 %v1584_v30 }
  0xb2   :  { %779 = vmatprep.subr.bf16.mxu0 %v1589_v31  ;;  %822 = vmatprep.subr.bf16.mxu1 %v1592_v32 }
  0xb5   :  { %780 = vmatpush1.bf16.msra.mxu0 %v1587_v33  ;;  %823 = vmatpush1.bf16.msra.mxu1 %v1590_v34 }
  0xb6   :  { %781 = vmatprep.subr.bf16.mxu0 %v1595_v35  ;;  %824 = vmatprep.subr.bf16.mxu1 %v1598_v36 }
  0xb9   :  { %782 = vmatpush1.bf16.msra.mxu0 %v1593_v37  ;;  %825 = vmatpush1.bf16.msra.mxu1 %v1596_v38 }
  0xba   :  { %1390 = vmatprep.subr.bf16.mxu0 %v1599_v41  ;;  %1412 = vmatprep.subr.bf16.mxu1 %v1600_v42 }
  0xbc   :  { %800 = vmatmul.mubr.bf16.vlgmr.msra.gmra.mrb[0].mxu0 %v98_v43  ;;  %843 = vmatmul.mubr.bf16.vlgmr.msra.gmra.mrb[0].mxu1 %v98_v43 }
  0xbd   :  { %1391 = vmatpush3.bf16.msra.mxu0 %v1601_v44  ;;  %1413 = vmatpush3.bf16.msra.mxu1 %v1602_v45 }
  0xbe   :  { %1392 = vmatprep.subr.bf16.mxu0 %v1603_v46  ;;  %1414 = vmatprep.subr.bf16.mxu1 %v1604_v47 }
  0xc1   :  { %1393 = vmatpush3.bf16.msra.mxu0 %v1605_v48  ;;  %1415 = vmatpush3.bf16.msra.mxu1 %v1606_v49 }
  0xc2   :  { %1394 = vmatprep.subr.bf16.mxu0 %v1607_v50  ;;  %1416 = vmatprep.subr.bf16.mxu1 %v1608_v51  ;;  %v1357_v51 = vld [vmem:[%s1923_s6] ss:$0 sm:$0xff]  ;;  %s1741_s6 = scalar_lea.vmem %s1248_s23, 256 }
  0xc3   :  { %p1742_p12 = scmp.ne.s32.totalorder %s1248_s23, %s1741_s6  ;;  %p1747_p0 = scmp.lt.s32.totalorder %s1741_s6, %s1741_s6 }
  0xc5   :  { %1395 = vmatpush3.bf16.msra.mxu0 %v1609_v52  ;;  %1417 = vmatpush3.bf16.msra.mxu1 %v1610_v53  ;;  %p1748_p1 = por %p1747_p0, %p1746_p13 }
  0xc6   :  { %1396 = vmatprep.subr.bf16.mxu0 %v1611_v54  ;;  %1418 = vmatprep.subr.bf16.mxu1 %v1612_v55 }
  0xc7   :  { %p1749_p2 = pnand %p1748_p1, %p1742_p12 }
  0xc9   :  { %1397 = vmatpush3.bf16.msra.mxu0 %v1613_v56  ;;  %1419 = vmatpush3.bf16.msra.mxu1 %v1614_v57 }
  0xca   :  { %1398 = vmatprep.subr.bf16.mxu0 %v1615_v58  ;;  %1420 = vmatprep.subr.bf16.mxu1 %v1616_v59 }
  0xcd   :  { %1399 = vmatpush3.bf16.msra.mxu0 %v1617_v60  ;;  %1421 = vmatpush3.bf16.msra.mxu1 %v1618_v61 }
  0xce   :  { %1400 = vmatprep.subr.bf16.mxu0 %v1619_v62  ;;  %1422 = vmatprep.subr.bf16.mxu1 %v1620_v63 }
  0xd1   :  { %1401 = vmatpush3.bf16.msra.mxu0 %v1621_v0  ;;  %1423 = vmatpush3.bf16.msra.mxu1 %v1622_v1 }
  0xd2   :  { %1402 = vmatprep.subr.bf16.mxu0 %v1623_v2  ;;  %1424 = vmatprep.subr.bf16.mxu1 %v1624_v3 }
  0xd5   :  { %1403 = vmatpush3.bf16.msra.mxu0 %v1625_v4  ;;  %1425 = vmatpush3.bf16.msra.mxu1 %v1626_v5 }
  0xd6   :  { %1404 = vmatprep.subr.bf16.mxu0 %v1627_v6  ;;  %1426 = vmatprep.subr.bf16.mxu1 %v1628_v7 }
  0xd9   :  { %1405 = vmatpush3.bf16.msra.mxu0 %v1629_v8  ;;  %1427 = vmatpush3.bf16.msra.mxu1 %v1630_v9 }
 0x18f   :  { %v801_v21 = vpop.f32.mrb[0].mxu0  ;;  %v844_v22 = vpop.f32.mrb[0].mxu1 }
 0x190   :  { %v875_v23 = vadd.f32 %v858_v17, %v801_v21  ;;  %v877_v24 = vadd.f32 %v866_v18, %v844_v22  ;;  %v803_v25 = vpop.f32.mrb[1].mxu0  ;;  %v846_v26 = vpop.f32.mrb[1].mxu1 }
 0x191   :  { %v876_v27 = vadd.f32 %v862_v19, %v803_v25  ;;  %v878_v28 = vadd.f32 %v870_v20, %v846_v26  ;;  %v805_v29 = vpop.f32.mrb[2].mxu0  ;;  %v848_v30 = vpop.f32.mrb[2].mxu1 }
 0x192   :  { %v879_v31 = vadd.f32 %v858_v17, %v805_v29  ;;  %v881_v32 = vadd.f32 %v866_v18, %v848_v30  ;;  %v807_v33 = vpop.f32.mrb[3].mxu0  ;;  %v850_v34 = vpop.f32.mrb[3].mxu1  ;;  %v883_v37 = vmax.f32 %v875_v23, 0.0  ;;  %v885_v38 = vmax.f32 %v877_v24, 0.0 }
 0x193   :  { %v880_v35 = vadd.f32 %v862_v19, %v807_v33  ;;  %v882_v36 = vadd.f32 %v870_v20, %v850_v34  ;;  %v884_v41 = vmax.f32 %v876_v27, 0.0  ;;  %v886_v42 = vmax.f32 %v878_v28, 0.0 }
 0x194   :  { %v887_v39 = vmax.f32 %v879_v31, 0.0  ;;  %v889_v40 = vmax.f32 %v881_v32, 0.0 }
 0x195   :  { %v888_v43 = vmax.f32 %v880_v35, 0.0  ;;  %v890_v44 = vmax.f32 %v882_v36, 0.0 }
 0x196   :  { %v891_v45 = vpack.c.bf16 %v887_v39, %v883_v37  ;;  %v893_v46 = vpack.c.bf16 %v889_v40, %v885_v38 }
 0x197   :  { %v892_v47 = vpack.c.bf16 %v888_v43, %v884_v41  ;;  %v894_v48 = vpack.c.bf16 %v890_v44, %v886_v42 }
 0x199   :  { %1190 = vmatprep.mubr.bf16.mxu0 %v892_v47  ;;  %1231 = vmatprep.mubr.bf16.mxu1 %v894_v48 }
 0x19a   :  { %1191 = vmatmul.mubr.bf16.vlgmr.msra.gmra.mrb[4].mxu0 %v891_v45  ;;  %1232 = vmatmul.mubr.bf16.vlgmr.msra.gmra.mrb[4].mxu1 %v893_v46 }
 0x26d   :  { %v1406_v49 = vpop.f32.mrb[4].mxu0  ;;  %v1428_v50 = vpop.f32.mrb[4].mxu1 }
 0x26e   :  { %v1407_v52 = vpop.f32.mrb[5].mxu0  ;;  %v1429_v53 = vpop.f32.mrb[5].mxu1 }
 0x26f   :  { %v1408_v54 = vadd.f32 %v1407_v52, %v1406_v49  ;;  %v1430_v55 = vadd.f32 %v1429_v53, %v1428_v50  ;;  %v1409_v56 = vpop.f32.mrb[6].mxu0  ;;  %v1431_v57 = vpop.f32.mrb[6].mxu1 }
 0x270   :  { %v1410_v58 = vpop.f32.mrb[7].mxu0  ;;  %v1432_v59 = vpop.f32.mrb[7].mxu1 }
 0x271   :  { %v1193_v60 = vadd.f32 %v1408_v54, %v1357_v51  ;;  %v1411_v61 = vadd.f32 %v1410_v58, %v1409_v56  ;;  %v1433_v62 = vadd.f32 %v1432_v59, %v1431_v57 }
 0x273   :  { %v1234_v63 = vadd.f32 %v1430_v55, %v1193_v60  ;;  %v1196_v0 = vadd.f32 %v1411_v61, %v1357_v51 }
 0x275   :  { %1240 = vst [vmem:[#allocation11] sm:$0xff] %v1234_v63  ;;  %v1237_v1 = vadd.f32 %v1433_v62, %v1196_v0 }
 0x277   :  { %1241 = vst [vmem:[#allocation11 + $0x8] sm:$0xff] %v1237_v1 }
 0x278   :  { %1752 = shalt.err (!%p1749_p2)
}
 0x279   :  { %s1753_s1 = scalar_lea.hbm %s1924_s7, 256 }
 0x27a   :  { %p1754_p3 = scmp.ne.s32.totalorder %s1924_s7, %s1753_s1  ;;  %p1757_p4 = scmp.lt.u32.totalorder %s1753_s1, %s1924_s7 }
 0x27c   :  { %p1759_p5 = pnand %p1757_p4, %p1754_p3 }
 0x27e   :  { %1762 = shalt.err (!%p1759_p5)
}
 0x27f   :  { %1253 = dma.vmem_to_hbm [thread:$0]  %s1248_s23, 256, %s1924_s7, [#allocation4], %s1776_s3, %s1776_s3, %s1777_s15  }
 0x280   :  { %1769 = dma.done.wait [#allocation4], 256  }
 0x281   :  { %1770 = vsyncadd [#allocation4], 4294967040 }
 0x282   :  { %1257 = vsyncpa [#allocation3], 1 }
 0x283   :  { %1258 = vsyncpa [#allocation6], 1 }
 0x284   :  { %1259 = vsyncpa [#allocation9], 1 }
 0x285   :  { %1260 = vsyncpa [#allocation4], 1 }

</bundles_post_ra>
